<compile_context>
chip_gen: v7x
topology: tpu7x:2x2x1
jax: 0.10.0
libtpu: 0.0.40
codegen_flags: <defaults>
</compile_context>

<pallas_src>
import functools

import jax
import jax.numpy as jnp
from jax.experimental import pallas as pl
from jax.experimental.pallas import tpu as pltpu


def _round_up(x, m):
    return ((x + m - 1) // m) * m


def _round_down(x, m):
    return (x // m) * m


def _tpu_vmem_and_tc_count():
    """(per-core VMEM bytes, TensorCore count) with a conservative fallback."""
    try:
        vmem = int(pltpu.get_tpu_info().vmem_capacity_bytes)
    except Exception:
        vmem = 64 << 20  # conservative (v7x-sized) default
    # v7x: 64 MiB VMEM per TC, 2 TCs/chip.  v5e/v6e: 128 MiB VMEM, single TC.
    n_tc = 2 if vmem <= (80 << 20) else 1
    return vmem, n_tc


def _hm_sumexp_kernel(x_ref, cf_ref, sumexp_ref, *,
                      inv_temp, tile_n, k_per_split, n_valid):
    """Accumulate exp-sum partials for one cluster_features tile.

    Grid = (num_splits, k_per_split); axis 0 is "parallel" (megacore), axis 1
    is the sequential reduction over this split's share of the N axis.

    x_ref      : (B, D)        bf16  inputs (resident across the whole grid)
    cf_ref     : (tile_n, D)   bf16  tile of cluster_features
    sumexp_ref : (1, B, 128)   f32   lane-dense running sum of exp(logits)
    """
    c = pl.program_id(0)
    k = pl.program_id(1)

    @pl.when(k == 0)
    def _():
        sumexp_ref[...] = jnp.zeros_like(sumexp_ref)

    # (B, D) x (tile_n, D) contracted on the lane dim of both operands
    # -> (B, tile_n), f32 accumulation on the MXU; no transpose of cf needed.
    logits = jax.lax.dot_general(
        x_ref[...], cf_ref[...],
        dimension_numbers=(((1,), (1,)), ((), ())),
        preferred_element_type=jnp.float32)
    # torch.exp with no max-subtraction (faithful to the module): assumes
    # L2-normalized features so logits*inv_temp stays well below f32 overflow.
    e = jnp.exp(logits * inv_temp)

    # Lane-dense accumulation: fold tile_n columns into 128 lanes with aligned
    # VPU adds; the single cross-lane reduce happens in the JAX epilogue.
    def fold128(v):
        acc = v[:, 0:128]
        for cc in range(1, tile_n // 128):
            acc = acc + v[:, cc * 128:(cc + 1) * 128]
        return acc

    col0 = (c * k_per_split + k) * tile_n
    straddles_end = col0 + tile_n > n_valid   # only the last (padded) tiles

    @pl.when(jnp.logical_not(straddles_end))
    def _():  # fast path: no padded columns in this tile
        sumexp_ref[...] += fold128(e)[None]

    @pl.when(straddles_end)
    def _():  # slow path: mask the columns past N (exp(0)=1 otherwise)
        col_ids = col0 + jax.lax.broadcasted_iota(jnp.int32, (1, tile_n), 1)
        e_masked = jnp.where(col_ids < n_valid, e, 0.0)
        sumexp_ref[...] += fold128(e_masked)[None]


def hybrid_memory_forward(inputs, indexes, labels, cluster_features, *,
                          temp=0.05, num_splits=None,
                          compute_dtype=jnp.bfloat16):
    """JAX/Pallas equivalent of HybridMemory.forward (is_target=False).

    inputs:           (B, D) float32
    indexes:          (B,)   int32
    labels:           (N,)   int32   (buffer self.labels)
    cluster_features: (N, D) float32 (buffer self.cluster_features)
    Returns scalar NLL loss (mean over batch), matching F.nll_loss defaults.
    Pass compute_dtype=jnp.float32 for a precision-sensitive (slower) stream.
    """
    B, D = inputs.shape
    N, Dc = cluster_features.shape
    assert D == Dc

    vmem_cap, n_tc = _tpu_vmem_and_tc_count()
    if num_splits is None:
        num_splits = n_tc              # 2 on v7x (megacore), 1 on v5e/v6e

    # Glue: targets = labels[indexes] (the module's buffer gather).
    # TODO(synk): labels == -1 (unclustered outliers) would silently yield
    # -log(1e-6) here; the PyTorch module would error inside F.nll_loss.
    targets = labels[indexes].astype(jnp.int32)

    cbytes = jnp.dtype(compute_dtype).itemsize
    x = inputs.astype(compute_dtype)
    cf = cluster_features.astype(compute_dtype)

    # Target logit via a tiny wrapper-side gather + row-wise dot (same
    # compute_dtype operands, f32 math) - removed from the kernel inner loop.
    cf_tgt = cluster_features[targets].astype(compute_dtype).astype(jnp.float32)
    tgt_logit = jnp.sum(x.astype(jnp.float32) * cf_tgt, axis=1) / temp  # (B,)

    # Pad the batch (sublane) dim to a multiple of 8; padded rows are ignored
    # in the epilogue.  The feature dim is NOT padded in HBM: the BlockSpecs
    # use the full last dim, so the dominant cf stream only moves real bytes.
    b_pad = max(8, _round_up(B, 8))
    if b_pad != B:
        x = jnp.pad(x, ((0, b_pad - B), (0, 0)))

    # --- generation-aware, byte-budgeted tiling over the N axis ------------
    d_lane = _round_up(D, 128)          # minor-dim padding inside VMEM vregs
    # Budget for everything that scales with tile_n: two streamed cf buffers
    # plus the (B, tile_n) f32 logits/exp temporaries.
    tile_budget = (18 << 20) if vmem_cap <= (80 << 20) else (40 << 20)
    per_row_bytes = 2 * d_lane * cbytes + 4 * b_pad * 4
    tile_n = max(128, _round_down(tile_budget // per_row_bytes, 128))
    tile_n = min(tile_n, _round_up(pl.cdiv(N, num_splits), 128))
    # Bound N-padding waste (<= ~10%) and give each split a few pipeline steps.
    while tile_n > 128:
        n_pad = _round_up(N, tile_n * num_splits)
        waste_ok = (n_pad - N) * 10 <= N
        steps_ok = (n_pad // (tile_n * num_splits) >= 4
                    or tile_n * num_splits >= n_pad)
        if waste_ok and steps_ok:
            break
        tile_n -= 128

    n_pad = _round_up(N, tile_n * num_splits)
    if n_pad != N:
        cf = jnp.pad(cf, ((0, n_pad - N), (0, 0)))
    k_per_split = n_pad // (tile_n * num_splits)

    # VMEM request: streamed cf tiles, resident inputs, output accumulator
    # double-buffers, in-kernel f32 temporaries, plus Mosaic scratch headroom;
    # capped at ~3/4 of this generation's physical VMEM.
    vmem_needed = (2 * tile_n * d_lane * cbytes     # double-buffered cf tiles
                   + 2 * b_pad * d_lane * cbytes    # resident inputs
                   + 2 * b_pad * 128 * 4            # output accumulator bufs
                   + 4 * b_pad * tile_n * 4         # logits / exp temporaries
                   + (4 << 20))                     # headroom
    vmem_limit = int(max(32 << 20, min(vmem_needed, (vmem_cap * 3) // 4)))

    kernel = functools.partial(
        _hm_sumexp_kernel,
        inv_temp=float(1.0 / temp),
        tile_n=tile_n,
        k_per_split=k_per_split,
        n_valid=N)

    cost = pl.CostEstimate(
        flops=int(2 * b_pad * n_pad * D),
        transcendentals=int(b_pad * n_pad),
        bytes_accessed=int(n_pad * D * cbytes + b_pad * D * cbytes
                           + num_splits * b_pad * 128 * 4),
    )

    def _run(single_buffer_invariants):
        x_kwargs = ({"pipeline_mode": pl.Buffered(1)}
                    if single_buffer_invariants else {})
        return pl.pallas_call(
            kernel,
            out_shape=jax.ShapeDtypeStruct((num_splits, b_pad, 128),
                                           jnp.float32),
            grid_spec=pltpu.PrefetchScalarGridSpec(
                num_scalar_prefetch=0,
                grid=(num_splits, k_per_split),
                in_specs=[
                    # Grid-invariant inputs: resident, single-buffered.
                    pl.BlockSpec((b_pad, D), lambda c, k: (0, 0), **x_kwargs),
                    # Streamed cluster_features tile for (split c, step k).
                    # (pl.Buffered(3) is a candidate sweep if DMA issue
                    #  latency is exposed at small per-tile times.)
                    pl.BlockSpec((tile_n, D),
                                 lambda c, k: (c * k_per_split + k, 0)),
                ],
                out_specs=pl.BlockSpec((1, b_pad, 128),
                                       lambda c, k: (c, 0, 0)),
            ),
            compiler_params=pltpu.CompilerParams(
                dimension_semantics=("parallel", "arbitrary"),
                vmem_limit_bytes=vmem_limit,
            ),
            cost_estimate=cost,
        )(x, cf)

    try:
        sum_part = _run(True)
    except Exception:
        # Fallback if this jax build rejects single-buffered pipeline_mode on
        # grid-invariant operands; default double-buffering costs only a
        # little extra VMEM.
        sum_part = _run(False)

    # Tiny (B,)-sized epilogue in plain JAX: combine per-split lane-dense
    # partials (single cross-lane reduce), then the module's custom
    # softmax + NLL.
    sum_e = jnp.sum(sum_part, axis=(0, 2))[:B]      # (B,)
    p_t = jnp.exp(tgt_logit) / (sum_e + 1e-6)
    return -jnp.mean(jnp.log(p_t + 1e-6))


if __name__ == "__main__":
    # Small, deterministic example consistent with the module:
    #   num_features (D) = 32, num_samples (N) = 256, batch B = 8
    key = jax.random.PRNGKey(0)
    k_x, k_cf, k_idx, k_lbl = jax.random.split(key, 4)

    B, D, N = 8, 32, 256
    temp = 0.05

    # inputs: L2-normalized features, as produced by a ReID backbone.
    x = jax.random.normal(k_x, (B, D), dtype=jnp.float32)
    x = x / jnp.linalg.norm(x, axis=1, keepdims=True)

    # Buffers: cluster_features L2-normalized rows, labels are cluster ids.
    cf = jax.random.normal(k_cf, (N, D), dtype=jnp.float32)
    cf = cf / jnp.linalg.norm(cf, axis=1, keepdims=True)
    labels = jax.random.randint(k_lbl, (N,), 0, N, dtype=jnp.int32)
    indexes = jax.random.randint(k_idx, (B,), 0, N, dtype=jnp.int32)

    loss = hybrid_memory_forward(x, indexes, labels, cf, temp=temp)
    loss = jax.block_until_ready(loss)

    tgt = labels[indexes]

    # Same-precision reference (bf16-rounded operands, f32 math): tight check
    # that the kernel implements the math correctly.
    xb = x.astype(jnp.bfloat16).astype(jnp.float32)
    cfb = cf.astype(jnp.bfloat16).astype(jnp.float32)
    eb = jnp.exp((xb @ cfb.T) / temp)
    pb = eb / (jnp.sum(eb, axis=1, keepdims=True) + 1e-6)
    ref_bf16 = -jnp.mean(jnp.log(pb[jnp.arange(B), tgt] + 1e-6))

    # Full-f32 PyTorch-semantics reference: bf16 streaming drifts slightly.
    ef = jnp.exp((x @ cf.T) / temp)
    pf = ef / (jnp.sum(ef, axis=1, keepdims=True) + 1e-6)
    ref_f32 = -jnp.mean(jnp.log(pf[jnp.arange(B), tgt] + 1e-6))

    assert jnp.allclose(loss, ref_bf16, rtol=1e-3, atol=1e-3), (loss, ref_bf16)
    assert jnp.allclose(loss, ref_f32, rtol=1e-1, atol=1e-1), (loss, ref_f32)
    print("KERNEL_OK")
</pallas_src>

<mosaic_0001>
module attributes {stable_mosaic.version = 11 : i64} {
  func.func @_hm_sumexp_kernel(%arg0: i32, %arg1: i32, %arg2: memref<8x32xbf16, #tpu.memory_space<vmem>>, %arg3: memref<128x32xbf16, #tpu.memory_space<vmem>>, %arg4: memref<1x8x128xf32, #tpu.memory_space<vmem>>) attributes {dimension_semantics = [#tpu.dimension_semantics<parallel>, #tpu.dimension_semantics<arbitrary>], iteration_bounds = array<i64: 2, 1>, scalar_prefetch = 0 : i64, scratch_operands = 0 : i64, tpu.core_type = #tpu.core_type<tc>, window_params = [{pipeline_mode = #tpu.pipeline_mode<synchronous>, transform_indices = @transform_0, window_bounds = array<i64: 8, 32>}, {transform_indices = @transform_1, window_bounds = array<i64: 128, 32>}, {transform_indices = @transform_2, window_bounds = array<i64: 1, 8, 128>}]} {
    %c0_i32 = arith.constant 0 : i32
    %0 = arith.cmpi eq, %arg1, %c0_i32 : i32
    %1 = arith.extui %0 : i1 to i32
    %c0_i32_0 = arith.constant 0 : i32
    %2 = arith.cmpi ne, %1, %c0_i32_0 : i32
    scf.if %2 {
      %cst_8 = arith.constant 0.000000e+00 : f32
      %19 = vector.broadcast %cst_8 : f32 to vector<1x8x128xf32>
      %c0_9 = arith.constant 0 : index
      %c0_10 = arith.constant 0 : index
      %c0_11 = arith.constant 0 : index
      %20 = vector.load %arg4[%c0_9, %c0_10, %c0_11] : memref<1x8x128xf32, #tpu.memory_space<vmem>>, vector<1x8x128xf32>
      tpu.vector_store %arg4[%c0_9, %c0_10, %c0_11], %19 {strides = array<i32>} : memref<1x8x128xf32, #tpu.memory_space<vmem>>, vector<1x8x128xf32>,
    } else {
    }
    %c0 = arith.constant 0 : index
    %c0_1 = arith.constant 0 : index
    %3 = vector.load %arg2[%c0, %c0_1] : memref<8x32xbf16, #tpu.memory_space<vmem>>, vector<8x32xbf16>
    %c0_2 = arith.constant 0 : index
    %c0_3 = arith.constant 0 : index
    %4 = vector.load %arg3[%c0_2, %c0_3] : memref<128x32xbf16, #tpu.memory_space<vmem>>, vector<128x32xbf16>
    %cst = arith.constant dense<0.000000e+00> : vector<8x128xf32>
    %5 = tpu.matmul %3, %4, %cst {dimension_numbers = #tpu.dot_dimension_numbers<[1], [1], [0], [0], [0, 0, 1, 0], [], []>} : vector<8x32xbf16>, vector<128x32xbf16>, vector<8x128xf32> -> vector<8x128xf32>
    %cst_4 = arith.constant 2.000000e+01 : f32
    %6 = vector.broadcast %cst_4 : f32 to vector<8x128xf32>
    %7 = arith.mulf %5, %6 : vector<8x128xf32>
    %8 = math.exp %7 : vector<8x128xf32>
    %c1_i32 = arith.constant 1 : i32
    %9 = arith.muli %arg0, %c1_i32 : i32
    %10 = arith.addi %9, %arg1 : i32
    %c128_i32 = arith.constant 128 : i32
    %11 = arith.muli %10, %c128_i32 : i32
    %c128_i32_5 = arith.constant 128 : i32
    %12 = arith.addi %11, %c128_i32_5 : i32
    %c256_i32 = arith.constant 256 : i32
    %13 = arith.cmpi sgt, %12, %c256_i32 : i32
    %true = arith.constant true
    %14 = arith.xori %13, %true : i1
    %15 = arith.extui %14 : i1 to i32
    %c0_i32_6 = arith.constant 0 : i32
    %16 = arith.cmpi ne, %15, %c0_i32_6 : i32
    scf.if %16 {
      %c0_8 = arith.constant 0 : index
      %c0_9 = arith.constant 0 : index
      %c0_10 = arith.constant 0 : index
      %19 = vector.load %arg4[%c0_8, %c0_9, %c0_10] : memref<1x8x128xf32, #tpu.memory_space<vmem>>, vector<1x8x128xf32>
      %20 = vector.shape_cast %8 : vector<8x128xf32> to vector<1x8x128xf32>
      %21 = arith.addf %19, %20 : vector<1x8x128xf32>
      %c0_11 = arith.constant 0 : index
      %c0_12 = arith.constant 0 : index
      %c0_13 = arith.constant 0 : index
      %22 = vector.load %arg4[%c0_11, %c0_12, %c0_13] : memref<1x8x128xf32, #tpu.memory_space<vmem>>, vector<1x8x128xf32>
      tpu.vector_store %arg4[%c0_11, %c0_12, %c0_13], %21 {strides = array<i32>} : memref<1x8x128xf32, #tpu.memory_space<vmem>>, vector<1x8x128xf32>,
    } else {
    }
    %17 = arith.extui %13 : i1 to i32
    %c0_i32_7 = arith.constant 0 : i32
    %18 = arith.cmpi ne, %17, %c0_i32_7 : i32
    scf.if %18 {
      %19 = tpu.iota {dimensions = array<i32: 1>} : vector<1x128xi32>
      %20 = vector.broadcast %11 : i32 to vector<1x128xi32>
      %21 = arith.addi %20, %19 : vector<1x128xi32>
      %c256_i32_8 = arith.constant 256 : i32
      %22 = vector.broadcast %c256_i32_8 : i32 to vector<1x128xi32>
      %23 = arith.cmpi slt, %21, %22 : vector<1x128xi32>
      %cst_9 = arith.constant 0.000000e+00 : f32
      %24 = vector.shape_cast %23 : vector<1x128xi1> to vector<1x128xi1>
      %25 = vector.broadcast %24 : vector<1x128xi1> to vector<8x128xi1>
      %26 = vector.broadcast %cst_9 : f32 to vector<8x128xf32>
      %27 = arith.select %25, %8, %26 : vector<8x128xi1>, vector<8x128xf32>
      %c0_10 = arith.constant 0 : index
      %c0_11 = arith.constant 0 : index
      %c0_12 = arith.constant 0 : index
      %28 = vector.load %arg4[%c0_10, %c0_11, %c0_12] : memref<1x8x128xf32, #tpu.memory_space<vmem>>, vector<1x8x128xf32>
      %29 = vector.shape_cast %27 : vector<8x128xf32> to vector<1x8x128xf32>
      %30 = arith.addf %28, %29 : vector<1x8x128xf32>
      %c0_13 = arith.constant 0 : index
      %c0_14 = arith.constant 0 : index
      %c0_15 = arith.constant 0 : index
      %31 = vector.load %arg4[%c0_13, %c0_14, %c0_15] : memref<1x8x128xf32, #tpu.memory_space<vmem>>, vector<1x8x128xf32>
      tpu.vector_store %arg4[%c0_13, %c0_14, %c0_15], %30 {strides = array<i32>} : memref<1x8x128xf32, #tpu.memory_space<vmem>>, vector<1x8x128xf32>,
    } else {
    }
    return
  }
  func.func @transform_0(%arg0: i32, %arg1: i32) -> (i32, i32) {
    %c0_i32 = arith.constant 0 : i32
    %c0_i32_0 = arith.constant 0 : i32
    %c0_i32_1 = arith.constant 0 : i32
    return %c0_i32, %c0_i32_0 : i32, i32
  }
  func.func @transform_1(%arg0: i32, %arg1: i32) -> (i32, i32) {
    %c1_i32 = arith.constant 1 : i32
    %0 = arith.muli %arg0, %c1_i32 : i32
    %1 = arith.addi %0, %arg1 : i32
    %c0_i32 = arith.constant 0 : i32
    %c0_i32_0 = arith.constant 0 : i32
    return %1, %c0_i32 : i32, i32
  }
  func.func @transform_2(%arg0: i32, %arg1: i32) -> (i32, i32, i32) {
    %c0_i32 = arith.constant 0 : i32
    %c0_i32_0 = arith.constant 0 : i32
    %c0_i32_1 = arith.constant 0 : i32
    return %arg0, %c0_i32, %c0_i32_0 : i32, i32, i32
  }
}

module attributes {stable_mosaic.version = 11 : i64} {
  func.func @_hm_sumexp_kernel(%arg0: i32, %arg1: i32, %arg2: memref<8x32xbf16, #tpu.memory_space<vmem>>, %arg3: memref<128x32xbf16, #tpu.memory_space<vmem>>, %arg4: memref<1x8x128xf32, #tpu.memory_space<vmem>>) attributes {dimension_semantics = [#tpu.dimension_semantics<parallel>, #tpu.dimension_semantics<arbitrary>], iteration_bounds = array<i64: 2, 1>, scalar_prefetch = 0 : i64, scratch_operands = 0 : i64, tpu.core_type = #tpu.core_type<tc>, window_params = [{pipeline_mode = #tpu.pipeline_mode<synchronous>, transform_indices = @transform_0, window_bounds = array<i64: 8, 32>}, {transform_indices = @transform_1, window_bounds = array<i64: 128, 32>}, {transform_indices = @transform_2, window_bounds = array<i64: 1, 8, 128>}]} {
    %c0_i32 = arith.constant 0 : i32
    %0 = arith.cmpi eq, %arg1, %c0_i32 : i32
    %1 = arith.extui %0 : i1 to i32
    %c0_i32_0 = arith.constant 0 : i32
    %2 = arith.cmpi ne, %1, %c0_i32_0 : i32
    scf.if %2 {
      %cst_8 = arith.constant 0.000000e+00 : f32
      %19 = vector.broadcast %cst_8 : f32 to vector<1x8x128xf32>
      %c0_9 = arith.constant 0 : index
      %c0_10 = arith.constant 0 : index
      %c0_11 = arith.constant 0 : index
      %20 = vector.load %arg4[%c0_9, %c0_10, %c0_11] : memref<1x8x128xf32, #tpu.memory_space<vmem>>, vector<1x8x128xf32>
      tpu.vector_store %arg4[%c0_9, %c0_10, %c0_11], %19 {strides = array<i32>} : memref<1x8x128xf32, #tpu.memory_space<vmem>>, vector<1x8x128xf32>,
    } else {
    }
    %c0 = arith.constant 0 : index
    %c0_1 = arith.constant 0 : index
    %3 = vector.load %arg2[%c0, %c0_1] : memref<8x32xbf16, #tpu.memory_space<vmem>>, vector<8x32xbf16>
    %c0_2 = arith.constant 0 : index
    %c0_3 = arith.constant 0 : index
    %4 = vector.load %arg3[%c0_2, %c0_3] : memref<128x32xbf16, #tpu.memory_space<vmem>>, vector<128x32xbf16>
    %cst = arith.constant dense<0.000000e+00> : vector<8x128xf32>
    %5 = tpu.matmul %3, %4, %cst {dimension_numbers = #tpu.dot_dimension_numbers<[1], [1], [0], [0], [0, 0, 1, 0], [], []>} : vector<8x32xbf16>, vector<128x32xbf16>, vector<8x128xf32> -> vector<8x128xf32>
    %cst_4 = arith.constant 2.000000e+01 : f32
    %6 = vector.broadcast %cst_4 : f32 to vector<8x128xf32>
    %7 = arith.mulf %5, %6 : vector<8x128xf32>
    %8 = math.exp %7 : vector<8x128xf32>
    %c1_i32 = arith.constant 1 : i32
    %9 = arith.muli %arg0, %c1_i32 : i32
    %10 = arith.addi %9, %arg1 : i32
    %c128_i32 = arith.constant 128 : i32
    %11 = arith.muli %10, %c128_i32 : i32
    %c128_i32_5 = arith.constant 128 : i32
    %12 = arith.addi %11, %c128_i32_5 : i32
    %c256_i32 = arith.constant 256 : i32
    %13 = arith.cmpi sgt, %12, %c256_i32 : i32
    %true = arith.constant true
    %14 = arith.xori %13, %true : i1
    %15 = arith.extui %14 : i1 to i32
    %c0_i32_6 = arith.constant 0 : i32
    %16 = arith.cmpi ne, %15, %c0_i32_6 : i32
    scf.if %16 {
      %c0_8 = arith.constant 0 : index
      %c0_9 = arith.constant 0 : index
      %c0_10 = arith.constant 0 : index
      %19 = vector.load %arg4[%c0_8, %c0_9, %c0_10] : memref<1x8x128xf32, #tpu.memory_space<vmem>>, vector<1x8x128xf32>
      %20 = vector.shape_cast %8 : vector<8x128xf32> to vector<1x8x128xf32>
      %21 = arith.addf %19, %20 : vector<1x8x128xf32>
      %c0_11 = arith.constant 0 : index
      %c0_12 = arith.constant 0 : index
      %c0_13 = arith.constant 0 : index
      %22 = vector.load %arg4[%c0_11, %c0_12, %c0_13] : memref<1x8x128xf32, #tpu.memory_space<vmem>>, vector<1x8x128xf32>
      tpu.vector_store %arg4[%c0_11, %c0_12, %c0_13], %21 {strides = array<i32>} : memref<1x8x128xf32, #tpu.memory_space<vmem>>, vector<1x8x128xf32>,
    } else {
    }
    %17 = arith.extui %13 : i1 to i32
    %c0_i32_7 = arith.constant 0 : i32
    %18 = arith.cmpi ne, %17, %c0_i32_7 : i32
    scf.if %18 {
      %19 = tpu.iota {dimensions = array<i32: 1>} : vector<1x128xi32>
      %20 = vector.broadcast %11 : i32 to vector<1x128xi32>
      %21 = arith.addi %20, %19 : vector<1x128xi32>
      %c256_i32_8 = arith.constant 256 : i32
      %22 = vector.broadcast %c256_i32_8 : i32 to vector<1x128xi32>
      %23 = arith.cmpi slt, %21, %22 : vector<1x128xi32>
      %cst_9 = arith.constant 0.000000e+00 : f32
      %24 = vector.shape_cast %23 : vector<1x128xi1> to vector<1x128xi1>
      %25 = vector.broadcast %24 : vector<1x128xi1> to vector<8x128xi1>
      %26 = vector.broadcast %cst_9 : f32 to vector<8x128xf32>
      %27 = arith.select %25, %8, %26 : vector<8x128xi1>, vector<8x128xf32>
      %c0_10 = arith.constant 0 : index
      %c0_11 = arith.constant 0 : index
      %c0_12 = arith.constant 0 : index
      %28 = vector.load %arg4[%c0_10, %c0_11, %c0_12] : memref<1x8x128xf32, #tpu.memory_space<vmem>>, vector<1x8x128xf32>
      %29 = vector.shape_cast %27 : vector<8x128xf32> to vector<1x8x128xf32>
      %30 = arith.addf %28, %29 : vector<1x8x128xf32>
      %c0_13 = arith.constant 0 : index
      %c0_14 = arith.constant 0 : index
      %c0_15 = arith.constant 0 : index
      %31 = vector.load %arg4[%c0_13, %c0_14, %c0_15] : memref<1x8x128xf32, #tpu.memory_space<vmem>>, vector<1x8x128xf32>
      tpu.vector_store %arg4[%c0_13, %c0_14, %c0_15], %30 {strides = array<i32>} : memref<1x8x128xf32, #tpu.memory_space<vmem>>, vector<1x8x128xf32>,
    } else {
    }
    return
  }
  func.func @transform_0(%arg0: i32, %arg1: i32) -> (i32, i32) {
    %c0_i32 = arith.constant 0 : i32
    %c0_i32_0 = arith.constant 0 : i32
    %c0_i32_1 = arith.constant 0 : i32
    return %c0_i32, %c0_i32_0 : i32, i32
  }
  func.func @transform_1(%arg0: i32, %arg1: i32) -> (i32, i32) {
    %c1_i32 = arith.constant 1 : i32
    %0 = arith.muli %arg0, %c1_i32 : i32
    %1 = arith.addi %0, %arg1 : i32
    %c0_i32 = arith.constant 0 : i32
    %c0_i32_0 = arith.constant 0 : i32
    return %1, %c0_i32 : i32, i32
  }
  func.func @transform_2(%arg0: i32, %arg1: i32) -> (i32, i32, i32) {
    %c0_i32 = arith.constant 0 : i32
    %c0_i32_0 = arith.constant 0 : i32
    %c0_i32_1 = arith.constant 0 : i32
    return %arg0, %c0_i32, %c0_i32_0 : i32, i32, i32
  }
}

</mosaic_0001>

<bundles_post_ra>
// kernel: tpu_custom_call.1
= control target key start
LH: loop header
LB: loop body
LE: loop exit
PB: predicated region body
PF: predicated region fallthrough
CT: control target
= control target key end

     0   :  { %7 = vsyncpa [#allocation3], 0  ;;  %s750_s0 = inlined_call_operand.vmem [shape: bf16[8,32], index: 0, kind: input, shape index: {}]   ;;  %s751_s1 = inlined_call_operand.vmem [shape: bf16[256,32], index: 1, kind: input, shape index: {}]   ;;  %s752_s2 = inlined_call_operand.hbm [shape: f32[2,8,128], index: 2, kind: output, shape index: {}]  }
   0x1   :  { %9 = vsyncpa [#allocation3 + $0x1], 0  ;;  %s621_s9 = smov 0   ;;  %s623_s10 = smov 0  }
   0x2   :  { %s625_s11 = smov 0   ;;  %s627_s12 = smov 0  }
   0x3   :  { %s629_s13 = smov 0   ;;  %s631_s14 = smov 0  }
   0x4 LB: > { %s403_s15 = sadd.s32 4294967295, %s601_s14   ;;  %s404_s16 = sadd.s32 4294967294, %s601_s14   ;;  %s601_s14 = sphi %s631_s14, %s15_s14   ;;  %s597_s13 = sphi %s629_s13, %s759_s13   ;;  %s593_s12 = sphi %s627_s12, %s758_s12   ;;  %s589_s11 = sphi %s625_s11, %s757_s11   ;;  %s585_s10 = sphi %s623_s10, %s756_s10   ;;  %s581_s9 = sphi %s621_s9, %s755_s9  }
   0x5   : > { %s27_s17 = sadd.s32 1, %s597_s13  ;;  %s83_s18 = sadd.s32 1, %s589_s11 }
   0x6   : > { %p29_p0 = scmp.ge.s32.totalorder %s27_s17, 2  ;;  %p93_p1 = scmp.ne.s32.totalorder %s589_s11, %s585_s10 }
   0x7   : > { %p94_p2 = scmp.eq.s32.totalorder %s403_s15, 1  ;;  %p99_p3 = scmp.ne.s32.totalorder %s585_s10, %s581_s9 }
   0x8   : > { %s761_s17 = smov (%p29_p0, %s27_s17), 0  ;;  %p100_p5 = scmp.eq.s32.totalorder %s404_s16, 1 }
   0x9   : > { %p661_p4 = por %p94_p2, %p93_p1  ;;  %s80_s20 = ssub.s32 %s597_s13, %s761_s17 }
   0xa   : > { %p407_p6 = scmp.ge.s32.totalorder %s601_s14, 1  ;;  %p81_p7 = scmp.eq.s32.totalorder %s80_s20, 0 }
   0xb   : > { %p668_p8 = por %p100_p5, %p99_p3  ;;  %p132_p9 = scmp.lt.s32.totalorder %s601_s14, 3 }
   0xc   : > { %s674_s22 = scalar_select %p81_p7, %s589_s11, %s83_s18  }
   0xd   : > { %p133_p10 = pnand %p407_p6, %p132_p9 }
   0xe   : > { %s152_s23 = sand.u32 (!%p133_p10), 1, %s585_s10   ;;  %s409_s24 = sshll.u32 (!%p133_p10), %s593_s12, 4  ;;  %v603_v0 = vmov (!%p133_p10), 0.0   ;;  %vm604_vm0 = vmmov (!%p133_p10), 0   ;;  %vm226_vm1 = vcmask (!%p133_p10), 261120  }
   0xf   : > { %136 = sbr.rel (%p133_p10) target bundleno = 356 (0x164), region = 28  ;;  %s408_s25 = sshll.u32 (!%p133_p10), %s152_s23, 3  ;;  %436 = vmatprep.subr.bf16.mxu0 (!%p133_p10), %v603_v0  ;;  %452 = vmatprep.mubr.msk.bf16.mxu0 (!%p133_p10), %vm604_vm0, %v603_v0  ;;  %v169_v17 = vld [vmem:[%s750_s0] sm:$0xf] (!%p133_p10) }
  0x10   : > { %p157_p11 = scmp.lt.s32.totalorder (!%p133_p10), %s409_s24, 31  ;;  %s680_s26 = scalar_lea.vmem (!%p133_p10), [#allocation2], %s408_s25 }
  0x11   : > { %168 = vst [vmem:[%s680_s26] sm:$0xff] (!%p133_p10), %v603_v0  ;;  %s420_s5 = sshll.u32 (!%p133_p10), %s593_s12, 7 }
  0x12   : > { %s299_s6 = sadd.s32 (!%p133_p10), 128, %s420_s5 }
  0x13   : > { %p421_p12 = scmp.gt.s32.totalorder (!%p133_p10), %s299_s6, 256 }
  0x16   : > { %s763_s24 = smov (!%p157_p11, %s409_s24), 31 }
  0x17   : > { %s410_s27 = sshll.u32 %s763_s24, 2 }
  0x18   : > { %s160_s30 = scalar_lea.vmem %s751_s1, %s410_s27  ;;  %v305_v25 = vld [vmem:[%s680_s26] sm:$0xff] (!%p421_p12) }
  0x19   : > { %v513_v1 = vld [vmem:[%s160_s30] sm:$0xff]   ;;  %v514_v3 = vld [vmem:[%s160_s30 + $0x8] sm:$0xff]   ;;  %v515_v5 = vld [vmem:[%s160_s30 + $0x10] sm:$0xff]  }
  0x1a   : > { %v231_v2 = vsel %vm226_vm1, %v513_v1, 0  ;;  %v234_v4 = vsel %vm226_vm1, %v514_v3, 0  ;;  %v237_v6 = vsel %vm226_vm1, %v515_v5, 0  ;;  %v516_v7 = vld [vmem:[%s160_s30 + $0x18] sm:$0xff]   ;;  %v517_v9 = vld [vmem:[%s160_s30 + $0x20] sm:$0xff]   ;;  %v518_v11 = vld [vmem:[%s160_s30 + $0x28] sm:$0xff]  }
  0x1b   : > { %437 = vmatpush3.bf16.xpose.msra.mxu0 %v231_v2  ;;  %v240_v8 = vsel %vm226_vm1, %v516_v7, 0  ;;  %v243_v10 = vsel %vm226_vm1, %v517_v9, 0  ;;  %v246_v12 = vsel %vm226_vm1, %v518_v11, 0  ;;  %v519_v13 = vld [vmem:[%s160_s30 + $0x30] sm:$0xff]   ;;  %v520_v15 = vld [vmem:[%s160_s30 + $0x38] sm:$0xff]  }
  0x1c   : > { %438 = vmatprep.subr.bf16.mxu0 %v603_v0  ;;  %v249_v14 = vsel %vm226_vm1, %v519_v13, 0  ;;  %v252_v16 = vsel %vm226_vm1, %v520_v15, 0 }
  0x23   : > { %439 = vmatpush3.bf16.xpose.msra.mxu0 %v234_v4 }
  0x24   : > { %440 = vmatprep.subr.bf16.mxu0 %v603_v0 }
  0x2b   : > { %441 = vmatpush3.bf16.xpose.msra.mxu0 %v237_v6 }
  0x2c   : > { %442 = vmatprep.subr.bf16.mxu0 %v603_v0 }
  0x33   : > { %443 = vmatpush3.bf16.xpose.msra.mxu0 %v240_v8 }
  0x34   : > { %444 = vmatprep.subr.bf16.mxu0 %v603_v0 }
  0x3b   : > { %445 = vmatpush3.bf16.xpose.msra.mxu0 %v243_v10 }
  0x3c   : > { %446 = vmatprep.subr.bf16.mxu0 %v603_v0 }
  0x43   : > { %447 = vmatpush3.bf16.xpose.msra.mxu0 %v246_v12 }
  0x44   : > { %448 = vmatprep.subr.bf16.mxu0 %v603_v0 }
  0x4b   : > { %449 = vmatpush3.bf16.xpose.msra.mxu0 %v249_v14 }
  0x4c   : > { %450 = vmatprep.subr.bf16.mxu0 %v603_v0 }
  0x53   : > { %451 = vmatpush3.bf16.xpose.msra.mxu0 %v252_v16 }
  0x5a   : > { %453 = vmatmul.mubr.msk.bf16.vlgmr.msra.gmra.mrb[0].mxu0 %vm226_vm1, %v169_v17 }
 0x12d   : > { %v288_v18 = vpop.f32.mrb[0].mxu0 }
 0x12e   : > { %v294_v19 = vmul.f32 20.0, %v288_v18  ;;  %v454_v20 = vpop.f32.mrb[1].mxu0 }
 0x12f   : > { %v291_v21 = vpop.f32.mrb[2].mxu0 }
 0x130   : > { %v295_v22 = vmul.f32 1.442695, %v294_v19  ;;  %v455_v23 = vpop.f32.mrb[3].mxu0 }
 0x132   : > { %521 = vpow2.f32 %v295_v22 }
 0x136   : > { %304 = sbr.rel (%p421_p12) target bundleno = 320 (0x140), region = 36 }
 0x13c   : > { %v522_v24 = vpop.eup %521 }
 0x13d   : > { %v306_v26 = vadd.f32 %v522_v24, %v305_v25 }
 0x13f   : > { %307 = vst [vmem:[%s680_s26] sm:$0xff] %v306_v26 }
 0x140 PF: > { %p422_p13 = scmp.le.s32.totalorder %s299_s6, 256 }
 0x141   : > { %v311_v27 = vlaneseq (!%p422_p13)  ;;  %v313_v28 = vstv (!%p422_p13), %s420_s5 }
 0x142   : > { %310 = sbr.rel (%p422_p13) target bundleno = 332 (0x14c), region = 40 }
 0x143   : > { %v312_v29 = vand.u32 (!%p422_p13), 127, %v311_v27 }
 0x145   : > { %v314_v30 = vadd.s32 (!%p422_p13), %v313_v28, %v312_v29 }
 0x146   : > { %v319_v31 = vld [vmem:[%s680_s26] sm:$0xff] (!%p422_p13) }
 0x147   : > { %vm315_vm2 = vcmp.lt.s32.totalorder (!%p422_p13), %v314_v30, 256 }
 0x148   : > { %v318_v32 = vsel (!%p422_p13), %vm315_vm2, %v522_v24, 0.0 }
 0x149   : > { %v320_v33 = vadd.f32 %v319_v31, %v318_v32 }
 0x14b   : > { %321 = vst [vmem:[%s680_s26] sm:$0xff] %v320_v33 }
 0x14c PF: > { %s706_s12 = scalar_lea.hbm %s752_s2, %s420_s5  ;;  %s336_s15 = sshll.u32 %s680_s26, 4  ;;  %s337_s15 = int_to_ptr.vmem [resolvable:$true] %s336_s15 }
 0x14d   : > { %s323_s16 = scalar_lea.sflag [#allocation3], %s152_s23  ;;  %s523_s18 = scalar_lea.vmem %s337_s15, 128 }
 0x14e   : > { %p524_p0 = scmp.ne.s32.totalorder %s337_s15, %s523_s18  ;;  %s605_s20 = smov [#allocation2]  }
 0x14f   : > { %s527_s24 = sshll.u32 %s605_s20, 4  ;;  %s528_s24 = int_to_ptr.vmem [resolvable:$false] %s527_s24 }
 0x150   : > { %p525_p1 = pnand %p524_p0, %p661_p4  ;;  %s529_s25 = scalar_lea.vmem %s528_s24, 256 }
 0x151   : > { %p530_p3 = scmp.lt.s32.totalorder %s337_s15, %s528_s24  ;;  %p531_p5 = scmp.lt.s32.totalorder %s529_s25, %s523_s18 }
 0x152   : > { %p526_p2 = pneg %p525_p1 }
 0x153   : > { %p532_p6 = por %p531_p5, %p530_p3 }
 0x155   : > { %p533_p7 = pnand %p532_p6, %p526_p2 }
 0x157   : > { %536 = shalt.err (!%p533_p7)
}
 0x158   : > { %s537_s23 = scalar_lea.hbm %s706_s12, 128  ;;  %s541_s28 = scalar_lea.hbm %s752_s2, 256 }
 0x159   : > { %p538_p9 = scmp.ne.s32.totalorder %s706_s12, %s537_s23  ;;  %p542_p12 = scmp.lt.u32.totalorder %s706_s12, %s752_s2 }
 0x15a   : > { %p543_p13 = scmp.lt.u32.totalorder %s541_s28, %s537_s23  ;;  %p545_p1 = scmp.lt.u32.totalorder %s537_s23, %s706_s12 }
 0x15b   : > { %p539_p10 = pnand %p538_p9, %p661_p4 }
 0x15c   : > { %p544_p0 = por %p543_p13, %p542_p12 }
 0x15d   : > { %p540_p11 = pneg %p539_p10 }
 0x15e   : > { %p546_p2 = por %p545_p1, %p544_p0 }
 0x160   : > { %p547_p3 = pnand %p546_p2, %p540_p11 }
 0x162   : > { %550 = shalt.err (!%p547_p3)
}
 0x163   : > { %456 = dma.vmem_to_hbm [thread:$0]  (%p661_p4), %s337_s15, 128, %s706_s12, %s323_s16  }
 0x164 PF: > { %p462_p5 = scmp.ge.s32.totalorder %s601_s14, 2  ;;  %s348_s3 = sand.u32 1, %s581_s9  }
 0x165   : > { %s349_s4 = scalar_lea.sflag [#allocation3], %s348_s3 }
 0x166   : > { %p459_p6 = pnand %p462_p5, %p668_p8 }
 0x168   : > { %576 = dma.done.wait (!%p459_p6), %s349_s4, 128  }
 0x169   : > { %578 = vsyncadd (!%p459_p6), %s349_s4, 4294967168  ;;  %s15_s14 = sadd.s32 1, %s601_s14   ;;  %s755_s9 = smov %s585_s10 }
 0x16a   : > { %p12_p7 = scmp.ge.s32.totalorder %s15_s14, 4   ;;  %s756_s10 = smov %s589_s11 }
 0x16b   : > { %s757_s11 = smov %s674_s22  ;;  %s758_s12 = smov %s597_s13 }
 0x16c   : > { %s759_s13 = smov %s761_s17  ;;  %14 = sbr.rel (!%p12_p7) target bundleno = 4 (0x4), region = 75 }
 0x173   :  { %354 = vsyncpa [#allocation3], 1 }
 0x174   :  { %356 = vsyncpa [#allocation3 + $0x1], 1 }

// kernel: tpu_custom_call.1
= control target key start
LH: loop header
LB: loop body
LE: loop exit
PB: predicated region body
PF: predicated region fallthrough
CT: control target
= control target key end

     0   :  { %7 = vsyncpa [#allocation3], 0  ;;  %s750_s0 = inlined_call_operand.vmem [shape: bf16[8,32], index: 0, kind: input, shape index: {}]   ;;  %s751_s1 = inlined_call_operand.vmem [shape: bf16[256,32], index: 1, kind: input, shape index: {}]   ;;  %s752_s2 = inlined_call_operand.hbm [shape: f32[2,8,128], index: 2, kind: output, shape index: {}]  }
   0x1   :  { %9 = vsyncpa [#allocation3 + $0x1], 0  ;;  %s621_s9 = smov 0   ;;  %s623_s10 = smov 0  }
   0x2   :  { %s625_s11 = smov 0   ;;  %s627_s12 = smov 0  }
   0x3   :  { %s629_s13 = smov 0   ;;  %s631_s14 = smov 0  }
   0x4 LB: > { %s403_s15 = sadd.s32 4294967295, %s601_s14   ;;  %s404_s16 = sadd.s32 4294967294, %s601_s14   ;;  %s601_s14 = sphi %s631_s14, %s15_s14   ;;  %s597_s13 = sphi %s629_s13, %s759_s13   ;;  %s593_s12 = sphi %s627_s12, %s758_s12   ;;  %s589_s11 = sphi %s625_s11, %s757_s11   ;;  %s585_s10 = sphi %s623_s10, %s756_s10   ;;  %s581_s9 = sphi %s621_s9, %s755_s9  }
   0x5   : > { %s27_s17 = sadd.s32 1, %s597_s13  ;;  %s83_s18 = sadd.s32 1, %s589_s11 }
   0x6   : > { %p29_p0 = scmp.ge.s32.totalorder %s27_s17, 2  ;;  %p93_p1 = scmp.ne.s32.totalorder %s589_s11, %s585_s10 }
   0x7   : > { %p94_p2 = scmp.eq.s32.totalorder %s403_s15, 1  ;;  %p99_p3 = scmp.ne.s32.totalorder %s585_s10, %s581_s9 }
   0x8   : > { %s761_s17 = smov (%p29_p0, %s27_s17), 0  ;;  %p100_p5 = scmp.eq.s32.totalorder %s404_s16, 1 }
   0x9   : > { %p661_p4 = por %p94_p2, %p93_p1  ;;  %s80_s20 = ssub.s32 %s597_s13, %s761_s17 }
   0xa   : > { %p407_p6 = scmp.ge.s32.totalorder %s601_s14, 1  ;;  %p81_p7 = scmp.eq.s32.totalorder %s80_s20, 0 }
   0xb   : > { %p668_p8 = por %p100_p5, %p99_p3  ;;  %p132_p9 = scmp.lt.s32.totalorder %s601_s14, 3 }
   0xc   : > { %s674_s22 = scalar_select %p81_p7, %s589_s11, %s83_s18  }
   0xd   : > { %p133_p10 = pnand %p407_p6, %p132_p9 }
   0xe   : > { %s152_s23 = sand.u32 (!%p133_p10), 1, %s585_s10   ;;  %s409_s24 = sshll.u32 (!%p133_p10), %s593_s12, 4  ;;  %v603_v0 = vmov (!%p133_p10), 0.0   ;;  %vm604_vm0 = vmmov (!%p133_p10), 0   ;;  %vm226_vm1 = vcmask (!%p133_p10), 261120  }
   0xf   : > { %136 = sbr.rel (%p133_p10) target bundleno = 356 (0x164), region = 28  ;;  %s408_s25 = sshll.u32 (!%p133_p10), %s152_s23, 3  ;;  %436 = vmatprep.subr.bf16.mxu0 (!%p133_p10), %v603_v0  ;;  %452 = vmatprep.mubr.msk.bf16.mxu0 (!%p133_p10), %vm604_vm0, %v603_v0  ;;  %v169_v17 = vld [vmem:[%s750_s0] sm:$0xf] (!%p133_p10) }
  0x10   : > { %p157_p11 = scmp.lt.s32.totalorder (!%p133_p10), %s409_s24, 31  ;;  %s680_s26 = scalar_lea.vmem (!%p133_p10), [#allocation2], %s408_s25 }
  0x11   : > { %168 = vst [vmem:[%s680_s26] sm:$0xff] (!%p133_p10), %v603_v0  ;;  %s420_s5 = sshll.u32 (!%p133_p10), %s593_s12, 7 }
  0x12   : > { %s299_s6 = sadd.s32 (!%p133_p10), 128, %s420_s5 }
  0x13   : > { %p421_p12 = scmp.gt.s32.totalorder (!%p133_p10), %s299_s6, 256 }
  0x16   : > { %s763_s24 = smov (!%p157_p11, %s409_s24), 31 }
  0x17   : > { %s410_s27 = sshll.u32 %s763_s24, 2 }
  0x18   : > { %s160_s30 = scalar_lea.vmem %s751_s1, %s410_s27  ;;  %v305_v25 = vld [vmem:[%s680_s26] sm:$0xff] (!%p421_p12) }
  0x19   : > { %v513_v1 = vld [vmem:[%s160_s30] sm:$0xff]   ;;  %v514_v3 = vld [vmem:[%s160_s30 + $0x8] sm:$0xff]   ;;  %v515_v5 = vld [vmem:[%s160_s30 + $0x10] sm:$0xff]  }
  0x1a   : > { %v231_v2 = vsel %vm226_vm1, %v513_v1, 0  ;;  %v234_v4 = vsel %vm226_vm1, %v514_v3, 0  ;;  %v237_v6 = vsel %vm226_vm1, %v515_v5, 0  ;;  %v516_v7 = vld [vmem:[%s160_s30 + $0x18] sm:$0xff]   ;;  %v517_v9 = vld [vmem:[%s160_s30 + $0x20] sm:$0xff]   ;;  %v518_v11 = vld [vmem:[%s160_s30 + $0x28] sm:$0xff]  }
  0x1b   : > { %437 = vmatpush3.bf16.xpose.msra.mxu0 %v231_v2  ;;  %v240_v8 = vsel %vm226_vm1, %v516_v7, 0  ;;  %v243_v10 = vsel %vm226_vm1, %v517_v9, 0  ;;  %v246_v12 = vsel %vm226_vm1, %v518_v11, 0  ;;  %v519_v13 = vld [vmem:[%s160_s30 + $0x30] sm:$0xff]   ;;  %v520_v15 = vld [vmem:[%s160_s30 + $0x38] sm:$0xff]  }
  0x1c   : > { %438 = vmatprep.subr.bf16.mxu0 %v603_v0  ;;  %v249_v14 = vsel %vm226_vm1, %v519_v13, 0  ;;  %v252_v16 = vsel %vm226_vm1, %v520_v15, 0 }
  0x23   : > { %439 = vmatpush3.bf16.xpose.msra.mxu0 %v234_v4 }
  0x24   : > { %440 = vmatprep.subr.bf16.mxu0 %v603_v0 }
  0x2b   : > { %441 = vmatpush3.bf16.xpose.msra.mxu0 %v237_v6 }
  0x2c   : > { %442 = vmatprep.subr.bf16.mxu0 %v603_v0 }
  0x33   : > { %443 = vmatpush3.bf16.xpose.msra.mxu0 %v240_v8 }
  0x34   : > { %444 = vmatprep.subr.bf16.mxu0 %v603_v0 }
  0x3b   : > { %445 = vmatpush3.bf16.xpose.msra.mxu0 %v243_v10 }
  0x3c   : > { %446 = vmatprep.subr.bf16.mxu0 %v603_v0 }
  0x43   : > { %447 = vmatpush3.bf16.xpose.msra.mxu0 %v246_v12 }
  0x44   : > { %448 = vmatprep.subr.bf16.mxu0 %v603_v0 }
  0x4b   : > { %449 = vmatpush3.bf16.xpose.msra.mxu0 %v249_v14 }
  0x4c   : > { %450 = vmatprep.subr.bf16.mxu0 %v603_v0 }
  0x53   : > { %451 = vmatpush3.bf16.xpose.msra.mxu0 %v252_v16 }
  0x5a   : > { %453 = vmatmul.mubr.msk.bf16.vlgmr.msra.gmra.mrb[0].mxu0 %vm226_vm1, %v169_v17 }
 0x12d   : > { %v288_v18 = vpop.f32.mrb[0].mxu0 }
 0x12e   : > { %v294_v19 = vmul.f32 20.0, %v288_v18  ;;  %v454_v20 = vpop.f32.mrb[1].mxu0 }
 0x12f   : > { %v291_v21 = vpop.f32.mrb[2].mxu0 }
 0x130   : > { %v295_v22 = vmul.f32 1.442695, %v294_v19  ;;  %v455_v23 = vpop.f32.mrb[3].mxu0 }
 0x132   : > { %521 = vpow2.f32 %v295_v22 }
 0x136   : > { %304 = sbr.rel (%p421_p12) target bundleno = 320 (0x140), region = 36 }
 0x13c   : > { %v522_v24 = vpop.eup %521 }
 0x13d   : > { %v306_v26 = vadd.f32 %v522_v24, %v305_v25 }
 0x13f   : > { %307 = vst [vmem:[%s680_s26] sm:$0xff] %v306_v26 }
 0x140 PF: > { %p422_p13 = scmp.le.s32.totalorder %s299_s6, 256 }
 0x141   : > { %v311_v27 = vlaneseq (!%p422_p13)  ;;  %v313_v28 = vstv (!%p422_p13), %s420_s5 }
 0x142   : > { %310 = sbr.rel (%p422_p13) target bundleno = 332 (0x14c), region = 40 }
 0x143   : > { %v312_v29 = vand.u32 (!%p422_p13), 127, %v311_v27 }
 0x145   : > { %v314_v30 = vadd.s32 (!%p422_p13), %v313_v28, %v312_v29 }
 0x146   : > { %v319_v31 = vld [vmem:[%s680_s26] sm:$0xff] (!%p422_p13) }
 0x147   : > { %vm315_vm2 = vcmp.lt.s32.totalorder (!%p422_p13), %v314_v30, 256 }
 0x148   : > { %v318_v32 = vsel (!%p422_p13), %vm315_vm2, %v522_v24, 0.0 }
 0x149   : > { %v320_v33 = vadd.f32 %v319_v31, %v318_v32 }
 0x14b   : > { %321 = vst [vmem:[%s680_s26] sm:$0xff] %v320_v33 }
 0x14c PF: > { %s706_s12 = scalar_lea.hbm %s752_s2, %s420_s5  ;;  %s336_s15 = sshll.u32 %s680_s26, 4  ;;  %s337_s15 = int_to_ptr.vmem [resolvable:$true] %s336_s15 }
 0x14d   : > { %s323_s16 = scalar_lea.sflag [#allocation3], %s152_s23  ;;  %s523_s18 = scalar_lea.vmem %s337_s15, 128 }
 0x14e   : > { %p524_p0 = scmp.ne.s32.totalorder %s337_s15, %s523_s18  ;;  %s605_s20 = smov [#allocation2]  }
 0x14f   : > { %s527_s24 = sshll.u32 %s605_s20, 4  ;;  %s528_s24 = int_to_ptr.vmem [resolvable:$false] %s527_s24 }
 0x150   : > { %p525_p1 = pnand %p524_p0, %p661_p4  ;;  %s529_s25 = scalar_lea.vmem %s528_s24, 256 }
 0x151   : > { %p530_p3 = scmp.lt.s32.totalorder %s337_s15, %s528_s24  ;;  %p531_p5 = scmp.lt.s32.totalorder %s529_s25, %s523_s18 }
 0x152   : > { %p526_p2 = pneg %p525_p1 }
 0x153   : > { %p532_p6 = por %p531_p5, %p530_p3 }
 0x155   : > { %p533_p7 = pnand %p532_p6, %p526_p2 }
 0x157   : > { %536 = shalt.err (!%p533_p7)
}
 0x158   : > { %s537_s23 = scalar_lea.hbm %s706_s12, 128  ;;  %s541_s28 = scalar_lea.hbm %s752_s2, 256 }
 0x159   : > { %p538_p9 = scmp.ne.s32.totalorder %s706_s12, %s537_s23  ;;  %p542_p12 = scmp.lt.u32.totalorder %s706_s12, %s752_s2 }
 0x15a   : > { %p543_p13 = scmp.lt.u32.totalorder %s541_s28, %s537_s23  ;;  %p545_p1 = scmp.lt.u32.totalorder %s537_s23, %s706_s12 }
 0x15b   : > { %p539_p10 = pnand %p538_p9, %p661_p4 }
 0x15c   : > { %p544_p0 = por %p543_p13, %p542_p12 }
 0x15d   : > { %p540_p11 = pneg %p539_p10 }
 0x15e   : > { %p546_p2 = por %p545_p1, %p544_p0 }
 0x160   : > { %p547_p3 = pnand %p546_p2, %p540_p11 }
 0x162   : > { %550 = shalt.err (!%p547_p3)
}
 0x163   : > { %456 = dma.vmem_to_hbm [thread:$0]  (%p661_p4), %s337_s15, 128, %s706_s12, %s323_s16  }
 0x164 PF: > { %p462_p5 = scmp.ge.s32.totalorder %s601_s14, 2  ;;  %s348_s3 = sand.u32 1, %s581_s9  }
 0x165   : > { %s349_s4 = scalar_lea.sflag [#allocation3], %s348_s3 }
 0x166   : > { %p459_p6 = pnand %p462_p5, %p668_p8 }
 0x168   : > { %576 = dma.done.wait (!%p459_p6), %s349_s4, 128  }
 0x169   : > { %578 = vsyncadd (!%p459_p6), %s349_s4, 4294967168  ;;  %s15_s14 = sadd.s32 1, %s601_s14   ;;  %s755_s9 = smov %s585_s10 }
 0x16a   : > { %p12_p7 = scmp.ge.s32.totalorder %s15_s14, 4   ;;  %s756_s10 = smov %s589_s11 }
 0x16b   : > { %s757_s11 = smov %s674_s22  ;;  %s758_s12 = smov %s597_s13 }
 0x16c   : > { %s759_s13 = smov %s761_s17  ;;  %14 = sbr.rel (!%p12_p7) target bundleno = 4 (0x4), region = 75 }
 0x173   :  { %354 = vsyncpa [#allocation3], 1 }
 0x174   :  { %356 = vsyncpa [#allocation3 + $0x1], 1 }

</bundles_post_ra>
